<compile_context>
chip_gen: v7x
topology: tpu7x:2x2x1
jax: 0.10.0
libtpu: 0.0.40
codegen_flags: <defaults>
</compile_context>

<pallas_src>
import jax
import jax.numpy as jnp
from jax.experimental import pallas as pl
from jax.experimental.pallas import tpu as pltpu

Z_DIM = 50
HIDDEN = (64, 32, 16)
EPS = 1e-5
LANES = 128      # padded feature width (all layer widths <= 64 < 128)


def z_discrim_kernel(x_ref, w_ref, v_ref, o_ref):
    """Full forward pass in one gridless invocation; everything lives in VMEM.

    x_ref : (B, Z_DIM)     f32   raw input (no host-side padding)
    w_ref : (3, 128, 128)  bf16  zero-padded W1 / W2 / W3
    v_ref : (8, 128)       f32   rows: [g1,g2,g3, be1,be2,be3, w4^T, b4*ones]
    o_ref : (B, 1)         f32
    """
    batch = x_ref.shape[0]
    inv_n = 1.0 / float(batch)

    h_bf = x_ref[...].astype(jnp.bfloat16)           # bf16 MXU operand, cast in VMEM
    h32 = None
    for i in range(3):                               # three FC + BN + ReLU blocks (static unroll)
        # Linear without bias: under train-mode BN the bias cancels exactly.
        w = w_ref[0, :Z_DIM, :] if i == 0 else w_ref[i]
        z = jnp.dot(h_bf, w, preferred_element_type=jnp.float32)     # (B, 128) f32
        # Single-sweep BatchNorm1d statistics (training semantics, biased variance).
        mu = jnp.sum(z, axis=0, keepdims=True) * inv_n
        ex2 = jnp.sum(z * z, axis=0, keepdims=True) * inv_n
        var = jnp.maximum(ex2 - mu * mu, 0.0)        # guard tiny negative cancellation
        # Fused affine: h = max(z*s + t, 0); rsqrt runs on the EUP slot.
        s = v_ref[i:i + 1, :] * jax.lax.rsqrt(var + EPS)
        t = v_ref[3 + i:4 + i, :] - mu * s
        h32 = jnp.maximum(z * s + t, 0.0)            # ReLU, f32
        h_bf = h32.astype(jnp.bfloat16)              # next MXU operand

    # Final Linear(16, 1): VPU multiply + XLU lane reduce instead of a degenerate N=1 matmul.
    w4_row = v_ref[6:7, :]                           # (1,128) f32, w4^T zero-padded
    b4_row = v_ref[7:8, :]                           # (1,128) f32, b4 broadcast across lanes
    out = jnp.sum(h32 * w4_row, axis=1, keepdims=True) + b4_row[:, :1]
    o_ref[...] = out.astype(o_ref.dtype)


def pack_params(params):
    """Pack parameters into two zero-padded, VMEM-friendly slabs.

    The per-layer linear biases b1..b3 are deliberately NOT packed: train-mode BatchNorm
    subtracts the batch mean, so they have no effect on the output.
    """
    (w1, b1, g1, be1, w2, b2, g2, be2, w3, b3, g3, be3, w4, b4) = params

    w_slab = jnp.zeros((3, LANES, LANES), jnp.float32)
    for i, w in enumerate((w1, w2, w3)):
        fin, fout = w.shape
        w_slab = w_slab.at[i, :fin, :fout].set(w)
    w_slab = w_slab.astype(jnp.bfloat16)             # native MXU dtype

    v_slab = jnp.zeros((8, LANES), jnp.float32)
    for i, g in enumerate((g1, g2, g3)):
        v_slab = v_slab.at[i, :g.shape[1]].set(g[0])
    for i, be in enumerate((be1, be2, be3)):
        v_slab = v_slab.at[3 + i, :be.shape[1]].set(be[0])
    v_slab = v_slab.at[6, :w4.shape[0]].set(w4[:, 0])   # w4^T as a row
    v_slab = v_slab.at[7, :].set(b4[0, 0])              # b4 broadcast across lanes
    return w_slab, v_slab


def _vmem_cap_bytes():
    """Generation-aware VMEM cap: ~7/8 of physical, leaving compiler-scratch headroom."""
    try:
        phys = pltpu.get_tpu_info().vmem_capacity_bytes
        return int(phys * 7 // 8)        # ~112 MiB on v5e/v6e, ~56 MiB on v7x
    except Exception:
        return 48 * 1024 * 1024          # conservative fallback, safe on every generation


def z_discrim_forward(x, packed):
    """x: (B, Z_DIM) float32; packed: (w_slab, v_slab) from pack_params."""
    w_slab, v_slab = packed
    B, feat = x.shape
    assert feat == Z_DIM

    flops = 2 * B * (Z_DIM * 64 + 64 * 32 + 32 * 16 + 16)
    bytes_accessed = x.size * 4 + w_slab.size * 2 + v_slab.size * 4 + B * 4
    # Whole problem sits in one VMEM block (no grid); live f32 activations ~5 KiB/row.
    # TODO(synk): for very large batches (esp. v7x's 64 MiB physical VMEM) switch to a
    # batch grid with two-pass BatchNorm (sum/sumsq scratch across an 'arbitrary' axis)
    # and dimension_semantics=("parallel",) so both v7x TensorCores are used.
    vmem_need = B * 5 * 1024 + 2 * (w_slab.size * 2 + v_slab.size * 4) + (2 << 20)
    vmem_limit = int(min(_vmem_cap_bytes(), max(32 * 1024 * 1024, vmem_need)))

    vmem = pl.BlockSpec(memory_space=pltpu.MemorySpace.VMEM)
    return pl.pallas_call(
        z_discrim_kernel,
        out_shape=jax.ShapeDtypeStruct((B, 1), jnp.float32),
        in_specs=[vmem, vmem, vmem],
        out_specs=vmem,
        compiler_params=pltpu.CompilerParams(vmem_limit_bytes=vmem_limit),
        cost_estimate=pl.CostEstimate(
            flops=flops, transcendentals=3 * LANES, bytes_accessed=bytes_accessed),
    )(x, w_slab, v_slab)


def init_params(key):
    """Deterministic synthetic parameters matching the PyTorch module shapes.

    Linear i: weight (Fin, Fout) [transposed vs. torch's (Fout, Fin)], bias (1, Fout).
    BatchNorm1d i: gamma ones (1, Fout), beta zeros (1, Fout).
    """
    dims = [Z_DIM, *HIDDEN, 1]
    params = []
    for i in range(4):
        fin, fout = dims[i], dims[i + 1]
        key, kw, kb = jax.random.split(key, 3)
        bound = 1.0 / jnp.sqrt(fin)
        params.append(jax.random.uniform(kw, (fin, fout), jnp.float32, -bound, bound))
        params.append(jax.random.uniform(kb, (1, fout), jnp.float32, -bound, bound))
        if i < 3:  # FC_BN_ReLU layers carry BN affine params
            params.append(jnp.ones((1, fout), jnp.float32))   # gamma
            params.append(jnp.zeros((1, fout), jnp.float32))  # beta
    return tuple(params)


def reference_forward(x, params):
    """Pure-f32 JAX reference with the PyTorch module's semantics (biases included)."""
    (w1, b1, g1, be1, w2, b2, g2, be2, w3, b3, g3, be3, w4, b4) = params

    def fc_bn_relu(h, w, b, g, be):
        z = h @ w + b
        mu = jnp.mean(z, axis=0, keepdims=True)
        var = jnp.mean((z - mu) ** 2, axis=0, keepdims=True)
        return jnp.maximum((z - mu) * jax.lax.rsqrt(var + EPS) * g + be, 0.0)

    h = fc_bn_relu(x, w1, b1, g1, be1)
    h = fc_bn_relu(h, w2, b2, g2, be2)
    h = fc_bn_relu(h, w3, b3, g3, be3)
    return h @ w4 + b4


if __name__ == "__main__":
    key = jax.random.PRNGKey(0)
    key, kx, kp = jax.random.split(key, 3)

    B = 8
    x = jax.random.normal(kx, (B, Z_DIM), jnp.float32)
    params = init_params(kp)
    packed = pack_params(params)

    out = jax.block_until_ready(z_discrim_forward(x, packed))
    ref = reference_forward(x, params)
    assert out.shape == (B, 1), out.shape
    # Kernel uses bf16 MXU operands (f32 accumulation/BN stats) vs. the pure-f32
    # reference, so allow ~1% deviations.
    assert jnp.allclose(out, ref, atol=3e-2, rtol=3e-2), (out, ref)

    # Also exercise a batch that is not a sublane multiple (BN stats stay exact: no padding).
    B2 = 5
    x2 = jax.random.normal(key, (B2, Z_DIM), jnp.float32)
    out2 = jax.block_until_ready(z_discrim_forward(x2, packed))
    ref2 = reference_forward(x2, params)
    assert out2.shape == (B2, 1), out2.shape
    assert jnp.allclose(out2, ref2, atol=3e-2, rtol=3e-2), (out2, ref2)

    print("KERNEL_OK")
</pallas_src>

<mosaic_0001>
module attributes {stable_mosaic.version = 11 : i64} {
  func.func @z_discrim_kernel(%arg0: memref<8x50xf32, #tpu.memory_space<vmem>>, %arg1: memref<3x128x128xbf16, #tpu.memory_space<vmem>>, %arg2: memref<8x128xf32, #tpu.memory_space<vmem>>, %arg3: memref<8x1xf32, #tpu.memory_space<vmem>>) attributes {dimension_semantics = [], scalar_prefetch = 0 : i64, scratch_operands = 0 : i64, tpu.core_type = #tpu.core_type<tc>} {
    %c0 = arith.constant 0 : index
    %c0_0 = arith.constant 0 : index
    %0 = vector.load %arg0[%c0, %c0_0] : memref<8x50xf32, #tpu.memory_space<vmem>>, vector<8x50xf32>
    %1 = arith.truncf %0 : vector<8x50xf32> to vector<8x50xbf16>
    %c0_1 = arith.constant 0 : index
    %c0_2 = arith.constant 0 : index
    %c0_3 = arith.constant 0 : index
    %2 = vector.load %arg1[%c0_1, %c0_2, %c0_3] : memref<3x128x128xbf16, #tpu.memory_space<vmem>>, vector<1x50x128xbf16>
    %3 = vector.shape_cast %2 : vector<1x50x128xbf16> to vector<50x128xbf16>
    %cst = arith.constant dense<0.000000e+00> : vector<8x128xf32>
    %4 = tpu.matmul %1, %3, %cst {dimension_numbers = #tpu.dot_dimension_numbers<[1], [0], [0], [1], [0, 0, 1, 1], [], []>} : vector<8x50xbf16>, vector<50x128xbf16>, vector<8x128xf32> -> vector<8x128xf32>
    %cst_4 = arith.constant dense<0.000000e+00> : vector<128xf32>
    %5 = vector.multi_reduction <add>, %4, %cst_4 [0] : vector<8x128xf32> to vector<128xf32>
    %6 = vector.shape_cast %5 : vector<128xf32> to vector<1x128xf32>
    %cst_5 = arith.constant 1.250000e-01 : f32
    %7 = vector.broadcast %cst_5 : f32 to vector<1x128xf32>
    %8 = arith.mulf %6, %7 : vector<1x128xf32>
    %9 = arith.mulf %4, %4 : vector<8x128xf32>
    %cst_6 = arith.constant dense<0.000000e+00> : vector<128xf32>
    %10 = vector.multi_reduction <add>, %9, %cst_6 [0] : vector<8x128xf32> to vector<128xf32>
    %11 = vector.shape_cast %10 : vector<128xf32> to vector<1x128xf32>
    %cst_7 = arith.constant 1.250000e-01 : f32
    %12 = vector.broadcast %cst_7 : f32 to vector<1x128xf32>
    %13 = arith.mulf %11, %12 : vector<1x128xf32>
    %14 = arith.mulf %8, %8 : vector<1x128xf32>
    %15 = arith.subf %13, %14 : vector<1x128xf32>
    %cst_8 = arith.constant 0.000000e+00 : f32
    %16 = vector.broadcast %cst_8 : f32 to vector<1x128xf32>
    %17 = arith.maximumf %15, %16 : vector<1x128xf32>
    %c0_9 = arith.constant 0 : index
    %c0_10 = arith.constant 0 : index
    %18 = vector.load %arg2[%c0_9, %c0_10] : memref<8x128xf32, #tpu.memory_space<vmem>>, vector<1x128xf32>
    %cst_11 = arith.constant 9.99999974E-6 : f32
    %19 = vector.broadcast %cst_11 : f32 to vector<1x128xf32>
    %20 = arith.addf %17, %19 : vector<1x128xf32>
    %21 = math.rsqrt %20 : vector<1x128xf32>
    %22 = arith.mulf %18, %21 : vector<1x128xf32>
    %c3 = arith.constant 3 : index
    %c0_12 = arith.constant 0 : index
    %23 = vector.load %arg2[%c3, %c0_12] : memref<8x128xf32, #tpu.memory_space<vmem>>, vector<1x128xf32>
    %24 = arith.mulf %8, %22 : vector<1x128xf32>
    %25 = arith.subf %23, %24 : vector<1x128xf32>
    %26 = vector.broadcast %22 : vector<1x128xf32> to vector<8x128xf32>
    %27 = arith.mulf %4, %26 : vector<8x128xf32>
    %28 = vector.broadcast %25 : vector<1x128xf32> to vector<8x128xf32>
    %29 = arith.addf %27, %28 : vector<8x128xf32>
    %cst_13 = arith.constant 0.000000e+00 : f32
    %30 = vector.broadcast %cst_13 : f32 to vector<8x128xf32>
    %31 = arith.maximumf %29, %30 : vector<8x128xf32>
    %32 = arith.truncf %31 : vector<8x128xf32> to vector<8x128xbf16>
    %c1 = arith.constant 1 : index
    %c0_14 = arith.constant 0 : index
    %c0_15 = arith.constant 0 : index
    %33 = vector.load %arg1[%c1, %c0_14, %c0_15] : memref<3x128x128xbf16, #tpu.memory_space<vmem>>, vector<1x128x128xbf16>
    %34 = vector.shape_cast %33 : vector<1x128x128xbf16> to vector<128x128xbf16>
    %cst_16 = arith.constant dense<0.000000e+00> : vector<8x128xf32>
    %35 = tpu.matmul %32, %34, %cst_16 {dimension_numbers = #tpu.dot_dimension_numbers<[1], [0], [0], [1], [0, 0, 1, 1], [], []>} : vector<8x128xbf16>, vector<128x128xbf16>, vector<8x128xf32> -> vector<8x128xf32>
    %cst_17 = arith.constant dense<0.000000e+00> : vector<128xf32>
    %36 = vector.multi_reduction <add>, %35, %cst_17 [0] : vector<8x128xf32> to vector<128xf32>
    %37 = vector.shape_cast %36 : vector<128xf32> to vector<1x128xf32>
    %cst_18 = arith.constant 1.250000e-01 : f32
    %38 = vector.broadcast %cst_18 : f32 to vector<1x128xf32>
    %39 = arith.mulf %37, %38 : vector<1x128xf32>
    %40 = arith.mulf %35, %35 : vector<8x128xf32>
    %cst_19 = arith.constant dense<0.000000e+00> : vector<128xf32>
    %41 = vector.multi_reduction <add>, %40, %cst_19 [0] : vector<8x128xf32> to vector<128xf32>
    %42 = vector.shape_cast %41 : vector<128xf32> to vector<1x128xf32>
    %cst_20 = arith.constant 1.250000e-01 : f32
    %43 = vector.broadcast %cst_20 : f32 to vector<1x128xf32>
    %44 = arith.mulf %42, %43 : vector<1x128xf32>
    %45 = arith.mulf %39, %39 : vector<1x128xf32>
    %46 = arith.subf %44, %45 : vector<1x128xf32>
    %cst_21 = arith.constant 0.000000e+00 : f32
    %47 = vector.broadcast %cst_21 : f32 to vector<1x128xf32>
    %48 = arith.maximumf %46, %47 : vector<1x128xf32>
    %c1_22 = arith.constant 1 : index
    %c0_23 = arith.constant 0 : index
    %49 = vector.load %arg2[%c1_22, %c0_23] : memref<8x128xf32, #tpu.memory_space<vmem>>, vector<1x128xf32>
    %cst_24 = arith.constant 9.99999974E-6 : f32
    %50 = vector.broadcast %cst_24 : f32 to vector<1x128xf32>
    %51 = arith.addf %48, %50 : vector<1x128xf32>
    %52 = math.rsqrt %51 : vector<1x128xf32>
    %53 = arith.mulf %49, %52 : vector<1x128xf32>
    %c4 = arith.constant 4 : index
    %c0_25 = arith.constant 0 : index
    %54 = vector.load %arg2[%c4, %c0_25] : memref<8x128xf32, #tpu.memory_space<vmem>>, vector<1x128xf32>
    %55 = arith.mulf %39, %53 : vector<1x128xf32>
    %56 = arith.subf %54, %55 : vector<1x128xf32>
    %57 = vector.broadcast %53 : vector<1x128xf32> to vector<8x128xf32>
    %58 = arith.mulf %35, %57 : vector<8x128xf32>
    %59 = vector.broadcast %56 : vector<1x128xf32> to vector<8x128xf32>
    %60 = arith.addf %58, %59 : vector<8x128xf32>
    %cst_26 = arith.constant 0.000000e+00 : f32
    %61 = vector.broadcast %cst_26 : f32 to vector<8x128xf32>
    %62 = arith.maximumf %60, %61 : vector<8x128xf32>
    %63 = arith.truncf %62 : vector<8x128xf32> to vector<8x128xbf16>
    %c2 = arith.constant 2 : index
    %c0_27 = arith.constant 0 : index
    %c0_28 = arith.constant 0 : index
    %64 = vector.load %arg1[%c2, %c0_27, %c0_28] : memref<3x128x128xbf16, #tpu.memory_space<vmem>>, vector<1x128x128xbf16>
    %65 = vector.shape_cast %64 : vector<1x128x128xbf16> to vector<128x128xbf16>
    %cst_29 = arith.constant dense<0.000000e+00> : vector<8x128xf32>
    %66 = tpu.matmul %63, %65, %cst_29 {dimension_numbers = #tpu.dot_dimension_numbers<[1], [0], [0], [1], [0, 0, 1, 1], [], []>} : vector<8x128xbf16>, vector<128x128xbf16>, vector<8x128xf32> -> vector<8x128xf32>
    %cst_30 = arith.constant dense<0.000000e+00> : vector<128xf32>
    %67 = vector.multi_reduction <add>, %66, %cst_30 [0] : vector<8x128xf32> to vector<128xf32>
    %68 = vector.shape_cast %67 : vector<128xf32> to vector<1x128xf32>
    %cst_31 = arith.constant 1.250000e-01 : f32
    %69 = vector.broadcast %cst_31 : f32 to vector<1x128xf32>
    %70 = arith.mulf %68, %69 : vector<1x128xf32>
    %71 = arith.mulf %66, %66 : vector<8x128xf32>
    %cst_32 = arith.constant dense<0.000000e+00> : vector<128xf32>
    %72 = vector.multi_reduction <add>, %71, %cst_32 [0] : vector<8x128xf32> to vector<128xf32>
    %73 = vector.shape_cast %72 : vector<128xf32> to vector<1x128xf32>
    %cst_33 = arith.constant 1.250000e-01 : f32
    %74 = vector.broadcast %cst_33 : f32 to vector<1x128xf32>
    %75 = arith.mulf %73, %74 : vector<1x128xf32>
    %76 = arith.mulf %70, %70 : vector<1x128xf32>
    %77 = arith.subf %75, %76 : vector<1x128xf32>
    %cst_34 = arith.constant 0.000000e+00 : f32
    %78 = vector.broadcast %cst_34 : f32 to vector<1x128xf32>
    %79 = arith.maximumf %77, %78 : vector<1x128xf32>
    %c2_35 = arith.constant 2 : index
    %c0_36 = arith.constant 0 : index
    %80 = vector.load %arg2[%c2_35, %c0_36] : memref<8x128xf32, #tpu.memory_space<vmem>>, vector<1x128xf32>
    %cst_37 = arith.constant 9.99999974E-6 : f32
    %81 = vector.broadcast %cst_37 : f32 to vector<1x128xf32>
    %82 = arith.addf %79, %81 : vector<1x128xf32>
    %83 = math.rsqrt %82 : vector<1x128xf32>
    %84 = arith.mulf %80, %83 : vector<1x128xf32>
    %c5 = arith.constant 5 : index
    %c0_38 = arith.constant 0 : index
    %85 = vector.load %arg2[%c5, %c0_38] : memref<8x128xf32, #tpu.memory_space<vmem>>, vector<1x128xf32>
    %86 = arith.mulf %70, %84 : vector<1x128xf32>
    %87 = arith.subf %85, %86 : vector<1x128xf32>
    %88 = vector.broadcast %84 : vector<1x128xf32> to vector<8x128xf32>
    %89 = arith.mulf %66, %88 : vector<8x128xf32>
    %90 = vector.broadcast %87 : vector<1x128xf32> to vector<8x128xf32>
    %91 = arith.addf %89, %90 : vector<8x128xf32>
    %cst_39 = arith.constant 0.000000e+00 : f32
    %92 = vector.broadcast %cst_39 : f32 to vector<8x128xf32>
    %93 = arith.maximumf %91, %92 : vector<8x128xf32>
    %c6 = arith.constant 6 : index
    %c0_40 = arith.constant 0 : index
    %94 = vector.load %arg2[%c6, %c0_40] : memref<8x128xf32, #tpu.memory_space<vmem>>, vector<1x128xf32>
    %c7 = arith.constant 7 : index
    %c0_41 = arith.constant 0 : index
    %95 = vector.load %arg2[%c7, %c0_41] : memref<8x128xf32, #tpu.memory_space<vmem>>, vector<1x128xf32>
    %96 = vector.broadcast %94 : vector<1x128xf32> to vector<8x128xf32>
    %97 = arith.mulf %93, %96 : vector<8x128xf32>
    %cst_42 = arith.constant dense<0.000000e+00> : vector<8xf32>
    %98 = vector.multi_reduction <add>, %97, %cst_42 [1] : vector<8x128xf32> to vector<8xf32>
    %99 = vector.shape_cast %98 : vector<8xf32> to vector<8x1xf32>
    %100 = vector.extract_strided_slice %95 {offsets = [0, 0], sizes = [1, 1], strides = [1, 1]} : vector<1x128xf32> to vector<1x1xf32>
    %101 = vector.broadcast %100 : vector<1x1xf32> to vector<8x1xf32>
    %102 = arith.addf %99, %101 : vector<8x1xf32>
    %c0_43 = arith.constant 0 : index
    %c0_44 = arith.constant 0 : index
    %103 = vector.load %arg3[%c0_43, %c0_44] : memref<8x1xf32, #tpu.memory_space<vmem>>, vector<8x1xf32>
    tpu.vector_store %arg3[%c0_43, %c0_44], %102 {strides = array<i32>} : memref<8x1xf32, #tpu.memory_space<vmem>>, vector<8x1xf32>,
    return
  }
}

</mosaic_0001>

<bundles_post_ra>
// kernel: tpu_custom_call.1
= control target key start
LH: loop header
LB: loop body
LE: loop exit
PB: predicated region body
PF: predicated region fallthrough
CT: control target
= control target key end

     0   :  { %8 = vsyncpa [#allocation3], 0  ;;  %s773_s0 = inlined_call_operand.hbm [shape: f32[8,50], index: 0, kind: input, shape index: {}]   ;;  %s774_s1 = inlined_call_operand.hbm [shape: bf16[3,128,128], index: 1, kind: input, shape index: {}]   ;;  %s775_s2 = inlined_call_operand.hbm [shape: f32[8,128], index: 2, kind: input, shape index: {}]   ;;  %s776_s3 = inlined_call_operand.vmem [shape: f32[8,1], index: 3, kind: output, shape index: {}]  }
   0x1   :  { %9 = vsyncpa [#allocation5], 0  ;;  %s673_s12 = smov [#allocation4]   ;;  %s603_s16 = scalar_lea.hbm %s774_s1, 3072 }
   0x2   :  { %s25_s13 = sshll.u32 %s673_s12, 4  ;;  %p604_p0 = scmp.ne.s32.totalorder %s774_s1, %s603_s16  ;;  %s26_s13 = int_to_ptr.vmem [resolvable:$true] %s25_s13 }
   0x3   :  { %p607_p1 = scmp.lt.u32.totalorder %s603_s16, %s774_s1 }
   0x5   :  { %p609_p2 = pnand %p607_p1, %p604_p0 }
   0x7   :  { %612 = shalt.err (!%p609_p2)
}
   0x8   :  { %s613_s21 = scalar_lea.vmem %s26_s13, 3072  ;;  %p618_p4 = scmp.lt.s32.totalorder %s26_s13, %s26_s13 }
   0x9   :  { %p614_p3 = scmp.ne.s32.totalorder %s26_s13, %s613_s21  ;;  %p619_p5 = scmp.lt.s32.totalorder %s613_s21, %s613_s21 }
   0xb   :  { %p620_p6 = por %p619_p5, %p618_p4 }
   0xd   :  { %p621_p7 = pnand %p620_p6, %p614_p3 }
   0xf   :  { %624 = shalt.err (!%p621_p7)
}
  0x10   :  { %s674_s22 = smov 64   ;;  %s675_s23 = smov 4  }
  0x11   :  { %31 = dma.hbm_to_vmem [thread:$0]  %s774_s1, 3072, %s26_s13, [#allocation5], %s674_s22, %s674_s22, %s675_s23  }
  0x12   :  { %s676_s26 = smov [#allocation2]   ;;  %s677_s28 = smov [#allocation6]  }
  0x13   :  { %s16_s27 = sshll.u32 %s676_s26, 4  ;;  %s38_s29 = sshll.u32 %s677_s28, 4  ;;  %s17_s27 = int_to_ptr.vmem [resolvable:$true] %s16_s27  ;;  %s39_s29 = int_to_ptr.vmem [resolvable:$true] %s38_s29 }
  0x14   :  { %s625_s5 = scalar_lea.hbm %s773_s0, 128 }
  0x15   :  { %p626_p8 = scmp.ne.s32.totalorder %s773_s0, %s625_s5  ;;  %p629_p9 = scmp.lt.u32.totalorder %s625_s5, %s773_s0 }
  0x17   :  { %p631_p10 = pnand %p629_p9, %p626_p8 }
  0x19   :  { %634 = shalt.err (!%p631_p10)
}
  0x1a   :  { %s635_s1 = scalar_lea.vmem %s17_s27, 128  ;;  %p640_p12 = scmp.lt.s32.totalorder %s17_s27, %s17_s27 }
  0x1b   :  { %p636_p11 = scmp.ne.s32.totalorder %s17_s27, %s635_s1  ;;  %p641_p13 = scmp.lt.s32.totalorder %s635_s1, %s635_s1 }
  0x1d   :  { %p642_p0 = por %p641_p13, %p640_p12 }
  0x1f   :  { %p643_p1 = pnand %p642_p0, %p636_p11 }
  0x21   :  { %646 = shalt.err (!%p643_p1)
}
  0x22   :  { %19 = dma.hbm_to_vmem [thread:$0]  %s773_s0, 128, %s17_s27, [#allocation3]  }
  0x23   :  { %s647_s14 = scalar_lea.hbm %s775_s2, 128 }
  0x24   :  { %p648_p2 = scmp.ne.s32.totalorder %s775_s2, %s647_s14  ;;  %p651_p3 = scmp.lt.u32.totalorder %s647_s14, %s775_s2 }
  0x26   :  { %p653_p4 = pnand %p651_p3, %p648_p2 }
  0x28   :  { %656 = shalt.err (!%p653_p4)
}
  0x29   :  { %s657_s19 = scalar_lea.vmem %s39_s29, 128  ;;  %p662_p6 = scmp.lt.s32.totalorder %s39_s29, %s39_s29 }
  0x2a   :  { %p658_p5 = scmp.ne.s32.totalorder %s39_s29, %s657_s19  ;;  %p663_p7 = scmp.lt.s32.totalorder %s657_s19, %s657_s19 }
  0x2c   :  { %p664_p8 = por %p663_p7, %p662_p6 }
  0x2e   :  { %p665_p9 = pnand %p664_p8, %p658_p5 }
  0x30   :  { %668 = shalt.err (!%p665_p9)
}
  0x31   :  { %41 = dma.hbm_to_vmem [thread:$0]  %s775_s2, 128, %s39_s29, [#allocation5]  }
  0x32   :  { %669 = dma.done.wait [#allocation3], 128  }
  0x33   :  { %670 = vsyncadd [#allocation3], 4294967168 }
  0x34   :  { %671 = dma.done.wait [#allocation5], 3200  }
  0x35   :  { %672 = vsyncadd [#allocation5], 4294964096  ;;  %v678_v0 = vmov 0.0   ;;  %vm679_vm0 = vmmov 0   ;;  %v577_v1 = vld [vmem:[#allocation4] sm:$0xff]   ;;  %v578_v2 = vld [vmem:[#allocation4 + $0x8] sm:$0xff]   ;;  %v155_v39 = vlaneseq }
  0x36   :  { %518 = vmatprep.subr.bf16.mxu0 %v678_v0  ;;  %526 = vmatprep.mubr.msk.bf16.mxu0 %vm679_vm0, %v678_v0  ;;  %vm86_vm1 = vcmask 1040384   ;;  %v580_v3 = vld [vmem:[#allocation4 + $0x18] ss:$0 sps:$4 sm:$0x11]   ;;  %v579_v4 = vld [vmem:[#allocation4 + $0x10] sm:$0xff]   ;;  %vm82_vm2 = vcmask 408576  }
  0x37   :  { %530 = vmatprep.subr.bf16.mxu1 %v678_v0  ;;  %546 = vmatprep.mubr.msk.bf16.mxu1 %vm679_vm0, %v678_v0  ;;  %v88_v5 = vsel %vm86_vm1, %v580_v3, 0  ;;  %v52_v6 = vld [vmem:[#allocation2] sm:$0xff]  ;;  %v581_v8 = vld [vmem:[#allocation4 + $0x40] sm:$0xff]   ;;  %v582_v9 = vld [vmem:[#allocation4 + $0x48] sm:$0xff]   ;;  %v156_v40 = vshrl.u32 %v155_v39, 7  ;;  %vm464_vm3 = vcmask 7168  }
  0x38   :  { %519 = vmatpush3.bf16.msra.mxu0 %v577_v1  ;;  %v53_v7 = vpack.c.bf16 %v52_v6, %v52_v6  ;;  %531 = vmatpush3.bf16.msra.mxu1 %v581_v8  ;;  %v583_v10 = vld [vmem:[#allocation4 + $0x50] sm:$0xff]   ;;  %v584_v11 = vld [vmem:[#allocation4 + $0x58] sm:$0xff]   ;;  %v585_v12 = vld [vmem:[#allocation4 + $0x60] sm:$0xff]  }
  0x39   :  { %520 = vmatprep.subr.bf16.mxu0 %v678_v0  ;;  %532 = vmatprep.subr.bf16.mxu1 %v678_v0  ;;  %v586_v13 = vld [vmem:[#allocation4 + $0x68] sm:$0xff]   ;;  %v587_v14 = vld [vmem:[#allocation4 + $0x70] sm:$0xff]   ;;  %v588_v15 = vld [vmem:[#allocation4 + $0x78] sm:$0xff]   ;;  %v755_v42 = vsub.s32 0, %v156_v40 }
  0x3a   :  { %v148_v41 = vld [vmem:[#allocation6] sm:$0x1]  ;;  %v152_v45 = vld [vmem:[#allocation6 + $0x3] sm:$0x1]  ;;  %v590_v55 = vld [vmem:[#allocation4 + $0x88] sm:$0xff]  }
  0x3b   :  { %v589_v54 = vld [vmem:[#allocation4 + $0x80] sm:$0xff]   ;;  %v591_v56 = vld [vmem:[#allocation4 + $0x90] sm:$0xff]   ;;  %v592_v57 = vld [vmem:[#allocation4 + $0x98] sm:$0xff]  }
  0x3c   :  { %521 = vmatpush3.bf16.msra.mxu0 %v578_v2  ;;  %533 = vmatpush3.bf16.msra.mxu1 %v582_v9  ;;  %v593_v58 = vld [vmem:[#allocation4 + $0xa0] sm:$0xff]   ;;  %v594_v59 = vld [vmem:[#allocation4 + $0xa8] sm:$0xff]   ;;  %v595_v60 = vld [vmem:[#allocation4 + $0xb0] sm:$0xff]  }
  0x3d   :  { %522 = vmatprep.subr.bf16.mxu0 %v678_v0  ;;  %534 = vmatprep.subr.bf16.mxu1 %v678_v0  ;;  %v596_v61 = vld [vmem:[#allocation4 + $0xb8] sm:$0xff]  }
  0x40   :  { %523 = vmatpush3.bf16.msra.mxu0 %v579_v4  ;;  %535 = vmatpush3.bf16.msra.mxu1 %v583_v10 }
  0x41   :  { %524 = vmatprep.subr.bf16.mxu0 %v678_v0  ;;  %536 = vmatprep.subr.bf16.mxu1 %v678_v0 }
  0x44   :  { %525 = vmatpush3.bf16.msra.mxu0 %v88_v5  ;;  %537 = vmatpush3.bf16.msra.mxu1 %v584_v11 }
  0x45   :  { %550 = vmatprep.subr.bf16.mxu0 %v678_v0  ;;  %538 = vmatprep.subr.bf16.mxu1 %v678_v0 }
  0x47   :  { %527 = vmatmul.mubr.msk.bf16.vlgmr.msra.gmra.mrb[0].mxu0 %vm82_vm2, %v53_v7 }
  0x48   :  { %566 = vmatprep.mubr.msk.bf16.mxu0 %vm679_vm0, %v678_v0  ;;  %539 = vmatpush3.bf16.msra.mxu1 %v585_v12 }
  0x49   :  { %540 = vmatprep.subr.bf16.mxu1 %v678_v0  ;;  %551 = vmatpush3.bf16.msra.mxu0 %v589_v54 }
  0x4a   :  { %552 = vmatprep.subr.bf16.mxu0 %v678_v0 }
  0x4c   :  { %541 = vmatpush3.bf16.msra.mxu1 %v586_v13 }
  0x4d   :  { %542 = vmatprep.subr.bf16.mxu1 %v678_v0  ;;  %553 = vmatpush3.bf16.msra.mxu0 %v590_v55 }
  0x4e   :  { %554 = vmatprep.subr.bf16.mxu0 %v678_v0 }
  0x50   :  { %543 = vmatpush3.bf16.msra.mxu1 %v587_v14 }
  0x51   :  { %544 = vmatprep.subr.bf16.mxu1 %v678_v0  ;;  %555 = vmatpush3.bf16.msra.mxu0 %v591_v56 }
  0x52   :  { %556 = vmatprep.subr.bf16.mxu0 %v678_v0 }
  0x54   :  { %545 = vmatpush3.bf16.msra.mxu1 %v588_v15 }
  0x55   :  { %557 = vmatpush3.bf16.msra.mxu0 %v592_v57  ;;  %v432_v57 = vld [vmem:[#allocation6 + $0x2] sm:$0x1] }
  0x56   :  { %558 = vmatprep.subr.bf16.mxu0 %v678_v0 }
  0x59   :  { %559 = vmatpush3.bf16.msra.mxu0 %v593_v58 }
  0x5a   :  { %560 = vmatprep.subr.bf16.mxu0 %v678_v0 }
  0x5d   :  { %561 = vmatpush3.bf16.msra.mxu0 %v594_v59 }
  0x5e   :  { %562 = vmatprep.subr.bf16.mxu0 %v678_v0 }
  0x61   :  { %563 = vmatpush3.bf16.msra.mxu0 %v595_v60  ;;  %v436_v60 = vld [vmem:[#allocation6 + $0x5] sm:$0x1] }
  0x62   :  { %564 = vmatprep.subr.bf16.mxu0 %v678_v0 }
  0x65   :  { %565 = vmatpush3.bf16.msra.mxu0 %v596_v61 }
 0x11a   :  { %v124_v16 = vpop.f32.mrb[0].mxu0 }
 0x11b   :  { %v130_v17 = vrot.slane %v124_v16, 4  ;;  %v137_v18 = vmul.f32 %v124_v16, %v124_v16  ;;  %v528_v19 = vpop.f32.mrb[1].mxu0 }
 0x11c   :  { %v127_v20 = vpop.f32.mrb[2].mxu0 }
 0x11d   :  { %v131_v21 = vadd.f32 %v130_v17, %v124_v16  ;;  %v138_v22 = vrot.slane %v137_v18, 4  ;;  %v529_v23 = vpop.f32.mrb[3].mxu0 }
 0x11f   :  { %v132_v24 = vrot.slane %v131_v21, 2  ;;  %v139_v25 = vadd.f32 %v138_v22, %v137_v18 }
 0x121   :  { %v133_v26 = vadd.f32 %v132_v24, %v131_v21  ;;  %v140_v27 = vrot.slane %v139_v25, 2  ;;  %v290_v21 = vld [vmem:[#allocation6 + $0x1] sm:$0x1]  ;;  %v294_v24 = vld [vmem:[#allocation6 + $0x4] sm:$0x1] }
 0x123   :  { %v134_v28 = vrot.slane %v133_v26, 1  ;;  %v141_v29 = vadd.f32 %v140_v27, %v139_v25 }
 0x125   :  { %v135_v30 = vadd.f32 %v134_v28, %v133_v26  ;;  %v142_v31 = vrot.slane %v141_v29, 1 }
 0x127   :  { %v136_v32 = vmul.f32 0.125, %v135_v30  ;;  %v143_v33 = vadd.f32 %v142_v31, %v141_v29 }
 0x129   :  { %v144_v34 = vmul.f32 0.125, %v143_v33  ;;  %v145_v35 = vmul.f32 %v136_v32, %v136_v32 }
 0x12b   :  { %v146_v36 = vsub.f32 %v144_v34, %v145_v35 }
 0x12d   :  { %v147_v37 = vmax.f32 %v146_v36, 0.0 }
 0x12f   :  { %v149_v38 = vadd.f32 1e-05, %v147_v37 }
 0x131   :  { %597 = vrsqrt.f32 %v149_v38 }
 0x13b   :  { %v598_v43 = vpop.eup %597 }
 0x13c   :  { %v151_v44 = vmul.f32 %v598_v43, %v148_v41 }
 0x13e   :  { %v158_v46 = vrot.slane %v151_v44, %v755_v42  ;;  %v153_v47 = vmul.f32 %v151_v44, %v136_v32 }
 0x140   :  { %v154_v48 = vsub.f32 %v152_v45, %v153_v47  ;;  %v159_v49 = vmul.f32 %v158_v46, %v124_v16 }
 0x142   :  { %v163_v50 = vrot.slane %v154_v48, %v755_v42 }
 0x144   :  { %v164_v51 = vadd.f32 %v163_v50, %v159_v49 }
 0x146   :  { %v165_v52 = vmax.f32 %v164_v51, 0.0 }
 0x148   :  { %v166_v53 = vpack.c.bf16 %v165_v52, %v165_v52 }
 0x14a   :  { %547 = vmatmul.mubr.bf16.vlgmr.msra.gmra.mrb[0].mxu1 %v166_v53 }
 0x21d   :  { %v266_v62 = vpop.f32.mrb[0].mxu1 }
 0x21e   :  { %v272_v63 = vrot.slane %v266_v62, 4  ;;  %v279_v1 = vmul.f32 %v266_v62, %v266_v62  ;;  %v548_v2 = vpop.f32.mrb[1].mxu1 }
 0x21f   :  { %v269_v3 = vpop.f32.mrb[2].mxu1 }
 0x220   :  { %v273_v4 = vadd.f32 %v272_v63, %v266_v62  ;;  %v280_v5 = vrot.slane %v279_v1, 4  ;;  %v549_v6 = vpop.f32.mrb[3].mxu1 }
 0x222   :  { %v274_v7 = vrot.slane %v273_v4, 2  ;;  %v281_v8 = vadd.f32 %v280_v5, %v279_v1 }
 0x224   :  { %v275_v9 = vadd.f32 %v274_v7, %v273_v4  ;;  %v282_v10 = vrot.slane %v281_v8, 2  ;;  %v493_v4 = vld [vmem:[#allocation6 + $0x6] ss:$0 sm:$0xff]  ;;  %v494_v7 = vld [vmem:[#allocation6 + $0x7] ss:$0 sm:$0xff] }
 0x226   :  { %v276_v11 = vrot.slane %v275_v9, 1  ;;  %v283_v12 = vadd.f32 %v282_v10, %v281_v8 }
 0x228   :  { %v277_v13 = vadd.f32 %v276_v11, %v275_v9  ;;  %v284_v14 = vrot.slane %v283_v12, 1 }
 0x22a   :  { %v278_v15 = vmul.f32 0.125, %v277_v13  ;;  %v285_v0 = vadd.f32 %v284_v14, %v283_v12 }
 0x22c   :  { %v286_v16 = vmul.f32 0.125, %v285_v0  ;;  %v287_v17 = vmul.f32 %v278_v15, %v278_v15 }
 0x22e   :  { %v288_v18 = vsub.f32 %v286_v16, %v287_v17 }
 0x230   :  { %v289_v19 = vmax.f32 %v288_v18, 0.0 }
 0x232   :  { %v291_v20 = vadd.f32 1e-05, %v289_v19 }
 0x234   :  { %599 = vrsqrt.f32 %v291_v20 }
 0x23e   :  { %v600_v22 = vpop.eup %599 }
 0x23f   :  { %v293_v23 = vmul.f32 %v600_v22, %v290_v21 }
 0x241   :  { %v295_v25 = vmul.f32 %v293_v23, %v278_v15  ;;  %v300_v26 = vrot.slane %v293_v23, %v755_v42 }
 0x243   :  { %v296_v27 = vsub.f32 %v294_v24, %v295_v25  ;;  %v301_v28 = vmul.f32 %v300_v26, %v266_v62 }
 0x245   :  { %v305_v29 = vrot.slane %v296_v27, %v755_v42 }
 0x247   :  { %v306_v30 = vadd.f32 %v305_v29, %v301_v28 }
 0x249   :  { %v307_v31 = vmax.f32 %v306_v30, 0.0 }
 0x24b   :  { %v308_v32 = vpack.c.bf16 %v307_v31, %v307_v31 }
 0x24d   :  { %567 = vmatmul.mubr.bf16.vlgmr.msra.gmra.mrb[4].mxu0 %v308_v32 }
 0x320   :  { %v408_v33 = vpop.f32.mrb[4].mxu0 }
 0x321   :  { %v414_v34 = vrot.slane %v408_v33, 4  ;;  %v421_v35 = vmul.f32 %v408_v33, %v408_v33  ;;  %v568_v36 = vpop.f32.mrb[5].mxu0 }
 0x322   :  { %v411_v37 = vpop.f32.mrb[6].mxu0 }
 0x323   :  { %v415_v38 = vadd.f32 %v414_v34, %v408_v33  ;;  %v422_v39 = vrot.slane %v421_v35, 4  ;;  %v569_v40 = vpop.f32.mrb[7].mxu0 }
 0x325   :  { %v416_v41 = vrot.slane %v415_v38, 2  ;;  %v423_v43 = vadd.f32 %v422_v39, %v421_v35 }
 0x327   :  { %v417_v44 = vadd.f32 %v416_v41, %v415_v38  ;;  %v424_v45 = vrot.slane %v423_v43, 2 }
 0x329   :  { %v418_v46 = vrot.slane %v417_v44, 1  ;;  %v425_v47 = vadd.f32 %v424_v45, %v423_v43 }
 0x32b   :  { %v419_v48 = vadd.f32 %v418_v46, %v417_v44  ;;  %v426_v49 = vrot.slane %v425_v47, 1 }
 0x32d   :  { %v420_v50 = vmul.f32 0.125, %v419_v48  ;;  %v427_v51 = vadd.f32 %v426_v49, %v425_v47 }
 0x32f   :  { %v428_v52 = vmul.f32 0.125, %v427_v51  ;;  %v429_v53 = vmul.f32 %v420_v50, %v420_v50 }
 0x331   :  { %v430_v54 = vsub.f32 %v428_v52, %v429_v53 }
 0x333   :  { %v431_v55 = vmax.f32 %v430_v54, 0.0 }
 0x335   :  { %v433_v56 = vadd.f32 1e-05, %v431_v55 }
 0x337   :  { %601 = vrsqrt.f32 %v433_v56 }
 0x341   :  { %v602_v58 = vpop.eup %601 }
 0x342   :  { %v435_v59 = vmul.f32 %v602_v58, %v432_v57 }
 0x344   :  { %v437_v61 = vmul.f32 %v435_v59, %v420_v50  ;;  %v442_v62 = vrot.slane %v435_v59, %v755_v42 }
 0x346   :  { %v438_v63 = vsub.f32 %v436_v60, %v437_v61  ;;  %v443_v1 = vmul.f32 %v442_v62, %v408_v33 }
 0x348   :  { %v447_v2 = vrot.slane %v438_v63, %v755_v42 }
 0x34a   :  { %v448_v3 = vadd.f32 %v447_v2, %v443_v1 }
 0x34c   :  { %v449_v5 = vmax.f32 %v448_v3, 0.0 }
 0x34e   :  { %v456_v6 = vmul.f32 %v493_v4, %v449_v5 }
 0x350   :  { %457 = vadd.xlane.f32.xlu0 %v456_v6 }
 0x3dd   :  { %v458_v8 = vpop.xlane.xlu0 %457 }
 0x3de   :  { %v463_v9 = vadd.f32 %v494_v7, %v458_v8 }
 0x3e0   :  { %465 = vst.msk [vmem:[%s776_s3] sm:$0xff] %vm464_vm3, %v463_v9 }
 0x3e1   :  { %470 = vsyncpa [#allocation3], 1 }
 0x3e2   :  { %471 = vsyncpa [#allocation5], 1 }

</bundles_post_ra>
